<compile_context>
chip_gen: v7x
topology: tpu7x:2x2x1
jax: 0.10.0
libtpu: 0.0.40
codegen_flags: <defaults>
</compile_context>

<pallas_src>
import functools

import jax
import jax.numpy as jnp
from jax import lax
from jax.experimental import pallas as pl
from jax.experimental.pallas import tpu as pltpu


# ------------------------- per-generation VMEM budgets -------------------------

def _vmem_budget():
    """Returns (vmem_limit_bytes for CompilerParams, tile-planning budget).

    Derived from the actual chip so v5e/v6e (128 MiB VMEM) get large tiles
    while v7x (64 MiB per TensorCore) stays inside its budget."""
    try:
        cap = int(pltpu.get_tpu_info().vmem_capacity_bytes)
    except Exception:  # interpret mode / older runtimes: assume the smallest part
        cap = 64 * 1024 * 1024
    limit = min(int(cap * 0.75), cap - (8 << 20))   # 96 MiB @128, 48 MiB @64
    limit = max(limit, 32 << 20)
    budget = max(limit - (8 << 20), 16 << 20)       # headroom for Mosaic scratch
    return limit, budget


def _pick_tile(dim, max_tile, align):
    """Block size for one dimension: the full dim when small, otherwise an
    `align`-multiple.  An exact divisor is only preferred when it is at least
    half of max_tile; a tiny divisor (e.g. 128 for HW=640) costs far more in
    per-step overhead and short stores than one masked edge block."""
    if dim <= max_tile:
        return dim
    best = 0
    for t in range(align, max_tile + 1, align):
        if dim % t == 0:
            best = t
    if 2 * best >= max_tile:
        return best
    return max(align, (max_tile // align) * align)


# ------------------------- 1x1 conv (NCHW-native) -------------------------

def _conv1x1_kernel(w_ref, b_ref, x_ref, o_ref):
    # w: [tm, C_in], x: [C_in, tn], bias: [tm, 1] (f32), out: [tm, tn]
    y = jnp.dot(w_ref[...], x_ref[...], preferred_element_type=jnp.float32)
    o_ref[...] = (y + b_ref[...]).astype(o_ref.dtype)


def _conv1x1_scaled_kernel(w_ref, b_ref, s_ref, x_ref, o_ref):
    # Per-(batch, in-channel) L2 scale fused into the matmul: scale in f32 for
    # accuracy, cast back to the activation dtype so bf16 models keep the
    # native bf16 MXU path; the accumulator stays f32 via
    # preferred_element_type.
    xs = (x_ref[...].astype(jnp.float32) * s_ref[...]).astype(x_ref.dtype)
    y = jnp.dot(w_ref[...], xs, preferred_element_type=jnp.float32)
    o_ref[...] = (y + b_ref[...]).astype(o_ref.dtype)


def _choose_conv_tiles(C_in, C_out, HW, x_isz, w_isz, o_isz, budget,
                       max_lane_tile):
    """Pick (tm, tn) for the conv.

    Priorities on a mem-bound kernel:
      1. tm == C_out whenever resident weight + double-buffered tiles fit the
         VMEM budget, so x is streamed from HBM exactly once;
      2. large, lane-dense tn (>=512 when possible) for long unmasked stores
         and few (~0.35 us) grid steps."""
    def fits(tm, tn):
        need = (2 * tm * C_in * w_isz          # weight tile (double-buffered)
                + 2 * C_in * tn * x_isz        # x tile
                + 2 * tm * tn * o_isz          # output tile
                + 2 * tm * 4 + 2 * C_in * 4)   # bias + optional scale column
        return need <= budget

    if HW <= max_lane_tile:
        tns = [HW]
    else:
        tns = []
        t = _pick_tile(HW, max_lane_tile, 128)
        while True:
            tns.append(t)
            if t <= 128:
                break
            t = max(128, (t // 2) // 128 * 128)

    # C_out tile candidates: full C_out first (fewest x re-reads), then the
    # fewest-way splits (each a multiple of 8).
    tms = [C_out]
    n_c = 2
    while True:
        tm = -(-C_out // n_c)
        tm = -(-tm // 8) * 8
        if tm < 8:
            break
        if tm < C_out and tm not in tms:
            tms.append(tm)
        if tm <= 8:
            break
        n_c += 1

    big_tns = [t for t in tns if t >= 512] or tns[:1]
    for cand_tns in (big_tns, tns):
        for tm in tms:
            for tn in cand_tns:
                if fits(tm, tn):
                    return tm, tn
    return tms[-1], tns[-1]   # pathological shapes; may exceed the soft budget


def conv1x1_nchw(x_nchw, weight_oc, bias, inv_scale=None, *, max_lane_tile=2048):
    """1x1 conv, NCHW in / NCHW out.

    x_nchw:    [B, C_in, H, W]
    weight_oc: [C_out, C_in]      (Conv2d k=1 weight, squeezed)
    bias:      [C_out]
    inv_scale: optional [B, C_in, 1] per-(batch, channel) multiplier on x.
    Returns    [B, C_out, H, W].
    """
    B, C_in, H, W = x_nchw.shape
    C_out = weight_oc.shape[0]
    HW = H * W

    vmem_limit, budget = _vmem_budget()

    x3 = x_nchw.reshape(B, C_in, HW)                  # free reshape (contiguous)
    b2 = bias.reshape(C_out, 1).astype(jnp.float32)

    tm, tn = _choose_conv_tiles(
        C_in, C_out, HW,
        x_isz=x_nchw.dtype.itemsize,
        w_isz=weight_oc.dtype.itemsize,
        o_isz=x_nchw.dtype.itemsize,
        budget=budget,
        max_lane_tile=max_lane_tile)
    # TODO(synk): a K-tiled accumulator fallback would be needed for extremely
    # large C_in (>~8k); un-tiled K covers all realistic Embedding2D widths.
    # TODO(synk): when ceil(C_out/tm) > 1 (weight too large to stay fully
    # resident), x is re-streamed once per C_out tile; a weight-innermost grid
    # ordering would trade that for repeated weight traffic.
    # TODO(synk): on v7x with small tn / small C_in, sweeping
    # pipeline_mode=pl.Buffered(3) on x/out specs can hide short-DMA latency.
    # TODO(synk): on v5e with f32 models and large C_in*C_out, a bf16 cast of
    # W and x before the dot keeps the kernel on the memory roofline.

    # C_out-tile axis outermost and "arbitrary": weight/bias blocks stay
    # resident across the whole inner (batch, spatial) sweep, and any megacore
    # split lands on batch/spatial (disjoint halves of x per TensorCore).
    grid = (pl.cdiv(C_out, tm), B, pl.cdiv(HW, tn))

    w_spec = pl.BlockSpec((tm, C_in), lambda c, b, s: (c, 0))
    b_spec = pl.BlockSpec((tm, 1), lambda c, b, s: (c, 0))
    x_spec = pl.BlockSpec((None, C_in, tn), lambda c, b, s: (b, 0, s))
    o_spec = pl.BlockSpec((None, tm, tn), lambda c, b, s: (b, c, s))

    if inv_scale is None:
        kernel = _conv1x1_kernel
        in_specs = [w_spec, b_spec, x_spec]
        operands = (weight_oc, b2, x3)
    else:
        kernel = _conv1x1_scaled_kernel
        s_spec = pl.BlockSpec((None, C_in, 1), lambda c, b, s: (b, 0, 0))
        in_specs = [w_spec, b_spec, s_spec, x_spec]
        operands = (weight_oc, b2, inv_scale.astype(jnp.float32), x3)

    y3 = pl.pallas_call(
        kernel,
        out_shape=jax.ShapeDtypeStruct((B, C_out, HW), x_nchw.dtype),
        grid_spec=pltpu.PrefetchScalarGridSpec(
            num_scalar_prefetch=0,
            grid=grid,
            in_specs=in_specs,
            out_specs=o_spec,
        ),
        compiler_params=pltpu.CompilerParams(
            dimension_semantics=("arbitrary", "parallel", "parallel"),
            vmem_limit_bytes=vmem_limit,
        ),
    )(*operands)
    return y3.reshape(B, C_out, H, W)


# ------------------------- row-wise L2 normalization -------------------------

def _row_sumsq_kernel(x_ref, o_ref, *, n_valid, lane_tile, eps):
    l = pl.program_id(1)

    @pl.when(l == 0)
    def _():
        o_ref[...] = jnp.zeros_like(o_ref)

    x = x_ref[...].astype(jnp.float32)
    if n_valid % lane_tile != 0:
        # Mask garbage lanes of the partial edge block out of the reduction.
        col = l * lane_tile + lax.broadcasted_iota(jnp.int32, x.shape, 1)
        x = jnp.where(col < n_valid, x, 0.0)
    o_ref[...] += jnp.sum(x * x, axis=-1, keepdims=True)

    @pl.when(l == pl.num_programs(1) - 1)
    def _():
        # 1 / max(||row||_2, eps) == rsqrt(max(sum_sq, eps^2))  (EUP, ~free)
        o_ref[...] = lax.rsqrt(jnp.maximum(o_ref[...], eps * eps))


def row_inv_l2_norm(x2d, *, max_row_tile=512, max_lane_tile=2048, eps=1e-12):
    """x2d: [R, L] -> [R, 1] float32 holding 1 / max(||row||_2, eps)."""
    R, L = x2d.shape
    vmem_limit, _ = _vmem_budget()
    tr = _pick_tile(R, max_row_tile, 8)
    tl = _pick_tile(L, max_lane_tile, 128)
    kernel = functools.partial(_row_sumsq_kernel, n_valid=L, lane_tile=tl, eps=eps)
    return pl.pallas_call(
        kernel,
        out_shape=jax.ShapeDtypeStruct((R, 1), jnp.float32),
        grid_spec=pltpu.PrefetchScalarGridSpec(
            num_scalar_prefetch=0,
            grid=(pl.cdiv(R, tr), pl.cdiv(L, tl)),
            in_specs=[pl.BlockSpec((tr, tl), lambda i, l: (i, l))],
            out_specs=pl.BlockSpec((tr, 1), lambda i, l: (i, 0)),
        ),
        # NOTE: the accumulator is only correct while the lane-reduction axis
        # stays last and "arbitrary" (un-split across cores).
        compiler_params=pltpu.CompilerParams(
            dimension_semantics=("parallel", "arbitrary"),
            vmem_limit_bytes=vmem_limit,
        ),
    )(x2d)


def _scale_rows_kernel(x_ref, s_ref, o_ref):
    o_ref[...] = (x_ref[...].astype(jnp.float32) * s_ref[...]).astype(o_ref.dtype)


def scale_rows(x2d, inv_norm, *, max_row_tile=512, max_lane_tile=2048):
    """Multiply each row of x2d [R, L] by inv_norm [R, 1]."""
    R, L = x2d.shape
    vmem_limit, _ = _vmem_budget()
    tr = _pick_tile(R, max_row_tile, 8)
    tl = _pick_tile(L, max_lane_tile, 128)
    return pl.pallas_call(
        _scale_rows_kernel,
        out_shape=jax.ShapeDtypeStruct((R, L), x2d.dtype),
        grid_spec=pltpu.PrefetchScalarGridSpec(
            num_scalar_prefetch=0,
            grid=(pl.cdiv(R, tr), pl.cdiv(L, tl)),
            in_specs=[pl.BlockSpec((tr, tl), lambda i, l: (i, l)),
                      pl.BlockSpec((tr, 1), lambda i, l: (i, 0))],
            out_specs=pl.BlockSpec((tr, tl), lambda i, l: (i, l)),
        ),
        compiler_params=pltpu.CompilerParams(
            dimension_semantics=("parallel", "parallel"),
            vmem_limit_bytes=vmem_limit,
        ),
    )(x2d, inv_norm)


def _l2_normalize_rows_kernel(x_ref, o_ref, *, eps):
    # Fused: the [tr, L] row tile stays resident in VMEM, x is read from HBM
    # exactly once (vs. twice for the reduce+scale two-kernel path).
    x = x_ref[...].astype(jnp.float32)
    ssq = jnp.sum(x * x, axis=-1, keepdims=True)
    inv = lax.rsqrt(jnp.maximum(ssq, eps * eps))
    o_ref[...] = (x * inv).astype(o_ref.dtype)


def l2_normalize_rows(x2d, *, eps=1e-12):
    """x2d: [R, L] -> row-wise x / max(||x||_2, eps), same dtype as x2d."""
    R, L = x2d.shape
    vmem_limit, budget = _vmem_budget()
    isz = x2d.dtype.itemsize
    per_row = 2 * 2 * L * isz + 2 * L * 4   # in/out double-buffered + f32 temps
    max_rows = budget // max(per_row, 1)

    if R <= 8:
        tr = R
    elif R <= max_rows and R <= 1024:
        tr = R
    else:
        tr = min(1024, max_rows) // 8 * 8
        if tr < 8:
            # Rows too long for a resident tile: streaming two-kernel fallback
            # (sum-of-squares reduce, then scale).
            inv = row_inv_l2_norm(x2d, eps=eps)
            return scale_rows(x2d, inv)

    kernel = functools.partial(_l2_normalize_rows_kernel, eps=eps)
    return pl.pallas_call(
        kernel,
        out_shape=jax.ShapeDtypeStruct((R, L), x2d.dtype),
        grid_spec=pltpu.PrefetchScalarGridSpec(
            num_scalar_prefetch=0,
            grid=(pl.cdiv(R, tr),),
            in_specs=[pl.BlockSpec((tr, L), lambda i: (i, 0))],
            out_specs=pl.BlockSpec((tr, L), lambda i: (i, 0)),
        ),
        compiler_params=pltpu.CompilerParams(
            dimension_semantics=("parallel",),
            vmem_limit_bytes=vmem_limit,
        ),
    )(x2d)


# ------------------------- Module forward -------------------------

def embedding2d_forward(x_nchw, weight_oc, bias, *,
                        apply_l2_norm=False, only_l2_norm=False):
    """Replicates Embedding2D.forward (default config: nonlinear='None',
    no dropout, no batchnorm, bias=True).

    x_nchw:    [B, C_in, H, W]
    weight_oc: [C_out, C_in]
    bias:      [C_out]
    Returns:   [B, C_out, H, W]   (or [B, C_in, H, W] if only_l2_norm)
    """
    B, C, H, W = x_nchw.shape
    if apply_l2_norm:
        # F.normalize(p=2, dim=1) on the [B, H*W, C] view normalizes each
        # (batch, channel) feature map over its H*W spatial positions.
        x2 = x_nchw.reshape(B * C, H * W)            # free reshape (contiguous)
        if only_l2_norm:
            return l2_normalize_rows(x2).reshape(B, C, H, W)
        # Fused path: apply the per-(b, c) scale inside the conv matmul.
        inv = row_inv_l2_norm(x2)                    # [B*C, 1] float32
        return conv1x1_nchw(x_nchw, weight_oc, bias,
                            inv_scale=inv.reshape(B, C, 1))
    return conv1x1_nchw(x_nchw, weight_oc, bias)
    # TODO(synk): dropout / BatchNorm1d / nonlinearity branches of get_conv2d
    # are disabled in the default Embedding2D config and are not implemented.


# ------------------------- Demo / self-test -------------------------

if __name__ == "__main__":
    # Small shapes consistent with the module (scaled-down inp_dim/out_dim).
    B, C_IN, H, W = 2, 128, 16, 16
    C_OUT = 256

    key = jax.random.PRNGKey(0)
    kx, kw, kb = jax.random.split(key, 3)
    x = jax.random.normal(kx, (B, C_IN, H, W), dtype=jnp.float32)
    weight = jax.random.normal(kw, (C_OUT, C_IN), dtype=jnp.float32) * (C_IN ** -0.5)
    bias = jax.random.normal(kb, (C_OUT,), dtype=jnp.float32) * 0.01

    # 1) Default path: plain 1x1 conv.
    y = jax.block_until_ready(embedding2d_forward(x, weight, bias))
    y_ref = jnp.einsum("bchw,oc->bohw", x, weight) + bias[None, :, None, None]
    assert y.shape == (B, C_OUT, H, W)
    assert jnp.allclose(y, y_ref, atol=1e-3, rtol=1e-3)

    # 2) only_l2_norm path (normalize over H*W per (batch, channel)), fused kernel.
    y_l2 = jax.block_until_ready(
        embedding2d_forward(x, weight, bias, apply_l2_norm=True, only_l2_norm=True))
    nrm = jnp.sqrt(jnp.sum(x.reshape(B, C_IN, H * W) ** 2, axis=-1, keepdims=True))
    x_l2_ref = (x.reshape(B, C_IN, H * W) / jnp.maximum(nrm, 1e-12)).reshape(x.shape)
    assert jnp.allclose(y_l2, x_l2_ref, atol=1e-4, rtol=1e-4)

    # 2b) Streaming fallback kernels (reduce + scale) give the same answer.
    inv = row_inv_l2_norm(x.reshape(B * C_IN, H * W))
    y_l2_fb = scale_rows(x.reshape(B * C_IN, H * W), inv).reshape(B, C_IN, H, W)
    y_l2_fb = jax.block_until_ready(y_l2_fb)
    assert jnp.allclose(y_l2_fb, x_l2_ref, atol=1e-4, rtol=1e-4)

    # 3) Fused l2-norm + conv path.
    y_f = jax.block_until_ready(
        embedding2d_forward(x, weight, bias, apply_l2_norm=True, only_l2_norm=False))
    y_f_ref = jnp.einsum("bchw,oc->bohw", x_l2_ref, weight) + bias[None, :, None, None]
    assert jnp.allclose(y_f, y_f_ref, atol=1e-3, rtol=1e-3)

    # 4) Non-8/128-multiple shapes.
    B2, C2_IN, C2_OUT, H2, W2 = 3, 96, 48, 5, 5
    kx2, kw2, kb2 = jax.random.split(jax.random.PRNGKey(1), 3)
    x2 = jax.random.normal(kx2, (B2, C2_IN, H2, W2), dtype=jnp.float32)
    w2 = jax.random.normal(kw2, (C2_OUT, C2_IN), dtype=jnp.float32) * (C2_IN ** -0.5)
    b2 = jax.random.normal(kb2, (C2_OUT,), dtype=jnp.float32) * 0.01
    y2 = jax.block_until_ready(embedding2d_forward(x2, w2, b2))
    y2_ref = jnp.einsum("bchw,oc->bohw", x2, w2) + b2[None, :, None, None]
    assert jnp.allclose(y2, y2_ref, atol=1e-3, rtol=1e-3)

    # 5) HW > lane tile and not a 128-multiple (exercises the masked edge
    #    lane block of the conv).
    B3, C3_IN, C3_OUT, H3, W3 = 1, 16, 8, 47, 47
    kx3, kw3, kb3 = jax.random.split(jax.random.PRNGKey(2), 3)
    x3 = jax.random.normal(kx3, (B3, C3_IN, H3, W3), dtype=jnp.float32)
    w3 = jax.random.normal(kw3, (C3_OUT, C3_IN), dtype=jnp.float32) * (C3_IN ** -0.5)
    b3 = jax.random.normal(kb3, (C3_OUT,), dtype=jnp.float32) * 0.01
    y3 = jax.block_until_ready(embedding2d_forward(x3, w3, b3))
    y3_ref = jnp.einsum("bchw,oc->bohw", x3, w3) + b3[None, :, None, None]
    assert jnp.allclose(y3, y3_ref, atol=1e-3, rtol=1e-3)

    print("KERNEL_OK")
</pallas_src>

<mosaic_0001>
module attributes {stable_mosaic.version = 11 : i64} {
  func.func @_conv1x1_kernel(%arg0: i32, %arg1: i32, %arg2: i32, %arg3: memref<256x128xf32, #tpu.memory_space<vmem>>, %arg4: memref<256x1xf32, #tpu.memory_space<vmem>>, %arg5: memref<1x128x256xf32, #tpu.memory_space<vmem>>, %arg6: memref<1x256x256xf32, #tpu.memory_space<vmem>>) attributes {dimension_semantics = [#tpu.dimension_semantics<arbitrary>, #tpu.dimension_semantics<parallel>, #tpu.dimension_semantics<parallel>], iteration_bounds = array<i64: 1, 2, 1>, scalar_prefetch = 0 : i64, scratch_operands = 0 : i64, tpu.core_type = #tpu.core_type<tc>, window_params = [{transform_indices = @transform_0, window_bounds = array<i64: 256, 128>}, {transform_indices = @transform_1, window_bounds = array<i64: 256, 1>}, {transform_indices = @transform_2, window_bounds = array<i64: 1, 128, 256>}, {transform_indices = @transform_3, window_bounds = array<i64: 1, 256, 256>}]} {
    %c0 = arith.constant 0 : index
    %c0_0 = arith.constant 0 : index
    %0 = vector.load %arg3[%c0, %c0_0] : memref<256x128xf32, #tpu.memory_space<vmem>>, vector<256x128xf32>
    %c0_1 = arith.constant 0 : index
    %c0_2 = arith.constant 0 : index
    %c0_3 = arith.constant 0 : index
    %1 = vector.load %arg5[%c0_1, %c0_2, %c0_3] : memref<1x128x256xf32, #tpu.memory_space<vmem>>, vector<1x128x256xf32>
    %2 = vector.shape_cast %1 : vector<1x128x256xf32> to vector<128x256xf32>
    %cst = arith.constant dense<0.000000e+00> : vector<256x256xf32>
    %3 = tpu.matmul %0, %2, %cst {dimension_numbers = #tpu.dot_dimension_numbers<[1], [0], [0], [1], [0, 0, 1, 1], [], []>} : vector<256x128xf32>, vector<128x256xf32>, vector<256x256xf32> -> vector<256x256xf32>
    %c0_4 = arith.constant 0 : index
    %c0_5 = arith.constant 0 : index
    %4 = vector.load %arg4[%c0_4, %c0_5] : memref<256x1xf32, #tpu.memory_space<vmem>>, vector<256x1xf32>
    %5 = vector.broadcast %4 : vector<256x1xf32> to vector<256x256xf32>
    %6 = arith.addf %3, %5 : vector<256x256xf32>
    %c0_6 = arith.constant 0 : index
    %c0_7 = arith.constant 0 : index
    %c0_8 = arith.constant 0 : index
    %7 = vector.load %arg6[%c0_6, %c0_7, %c0_8] : memref<1x256x256xf32, #tpu.memory_space<vmem>>, vector<1x256x256xf32>
    %8 = vector.shape_cast %7 : vector<1x256x256xf32> to vector<256x256xf32>
    %9 = vector.shape_cast %6 : vector<256x256xf32> to vector<1x256x256xf32>
    tpu.vector_store %arg6[%c0_6, %c0_7, %c0_8], %9 {strides = array<i32>} : memref<1x256x256xf32, #tpu.memory_space<vmem>>, vector<1x256x256xf32>,
    return
  }
  func.func @transform_0(%arg0: i32, %arg1: i32, %arg2: i32) -> (i32, i32) {
    %c0_i32 = arith.constant 0 : i32
    %c0_i32_0 = arith.constant 0 : i32
    return %arg0, %c0_i32 : i32, i32
  }
  func.func @transform_1(%arg0: i32, %arg1: i32, %arg2: i32) -> (i32, i32) {
    %c0_i32 = arith.constant 0 : i32
    %c0_i32_0 = arith.constant 0 : i32
    return %arg0, %c0_i32 : i32, i32
  }
  func.func @transform_2(%arg0: i32, %arg1: i32, %arg2: i32) -> (i32, i32, i32) {
    %c0_i32 = arith.constant 0 : i32
    %c0_i32_0 = arith.constant 0 : i32
    return %arg1, %c0_i32, %arg2 : i32, i32, i32
  }
  func.func @transform_3(%arg0: i32, %arg1: i32, %arg2: i32) -> (i32, i32, i32) {
    %c0_i32 = arith.constant 0 : i32
    return %arg1, %arg0, %arg2 : i32, i32, i32
  }
}

</mosaic_0001>

<bundles_post_ra>
// kernel: tpu_custom_call.1
= control target key start
LH: loop header
LB: loop body
LE: loop exit
PB: predicated region body
PF: predicated region fallthrough
CT: control target
= control target key end

     0   :  { %8 = vsyncpa [#allocation3], 0  ;;  %s1809_s0 = inlined_call_operand.vmem [shape: f32[256,128], index: 0, kind: input, shape index: {}]   ;;  %s1810_s1 = inlined_call_operand.vmem [shape: f32[256,1], index: 1, kind: input, shape index: {}]   ;;  %s1811_s2 = inlined_call_operand.hbm [shape: f32[2,128,256], index: 2, kind: input, shape index: {}]   ;;  %s1812_s3 = inlined_call_operand.hbm [shape: f32[2,256,256], index: 3, kind: output, shape index: {}]  }
   0x1   :  { %10 = vsyncpa [#allocation3 + $0x1], 0 }
   0x2   :  { %11 = vsyncpa [#allocation4], 0 }
   0x3   :  { %13 = vsyncpa [#allocation4 + $0x1], 0  ;;  %s1260_s12 = smov 0   ;;  %s1262_s13 = smov 0  }
   0x4   :  { %s1264_s14 = smov 0   ;;  %s1266_s15 = smov 0  }
   0x5   :  { %s1268_s16 = smov 0   ;;  %s1270_s17 = smov 0  }
   0x6 LB: > { %s981_s18 = sadd.s32 4294967295, %s1230_s17   ;;  %s982_s19 = sadd.s32 4294967294, %s1230_s17   ;;  %s1230_s17 = sphi %s1270_s17, %s19_s17   ;;  %s1226_s16 = sphi %s1268_s16, %s1827_s16   ;;  %s1222_s15 = sphi %s1266_s15, %s1826_s15   ;;  %s1218_s14 = sphi %s1264_s14, %s1825_s14   ;;  %s1214_s13 = sphi %s1262_s13, %s1824_s13   ;;  %s1210_s12 = sphi %s1260_s12, %s1823_s12  }
   0x7   : > { %s34_s20 = sadd.s32 1, %s1226_s16  ;;  %s99_s21 = sadd.s32 1, %s1218_s14 }
   0x8   : > { %p36_p0 = scmp.ge.s32.totalorder %s34_s20, 2  ;;  %p106_p1 = scmp.ne.s32.totalorder %s1218_s14, %s1214_s13 }
   0x9   : > { %p107_p2 = scmp.eq.s32.totalorder %s1230_s17, 0  ;;  %p112_p3 = scmp.ne.s32.totalorder %s1214_s13, %s1210_s12 }
   0xa   : > { %s1829_s20 = smov (%p36_p0, %s34_s20), 0  ;;  %p113_p5 = scmp.eq.s32.totalorder %s981_s18, 0 }
   0xb   : > { %p1301_p4 = por %p107_p2, %p106_p1  ;;  %s94_s23 = ssub.s32 %s1226_s16, %s1829_s20 }
   0xc   : > { %p140_p6 = scmp.eq.s32.totalorder %s981_s18, 1  ;;  %p97_p7 = scmp.eq.s32.totalorder %s94_s23, 0 }
   0xd   : > { %p1307_p8 = por %p113_p5, %p112_p3  ;;  %p146_p10 = scmp.eq.s32.totalorder %s982_s19, 1 }
   0xe   : > { %p1311_p9 = por %p140_p6, %p106_p1  ;;  %p1060_p13 = scmp.lt.s32.totalorder %s1230_s17, 2 }
   0xf   : > { %s1316_s26 = scalar_select %p97_p7, %s1218_s14, %s99_s21  }
  0x10   : > { %s1816_s25 = scalar_select %p1311_p9, 1, 0 }
  0x11   : > { %p1318_p11 = por %p146_p10, %p112_p3  ;;  %s184_s28 = sand.u32 1, %s1218_s14  }
  0x12   : > { %s987_s29 = sshll.u32 %s184_s28, 8  ;;  %s998_s30 = sshll.u32 %s1226_s16, 12 }
  0x13   : > { %s1817_s27 = scalar_select %p1318_p11, 1, 0 }
  0x14   : > { %s1329_s6 = scalar_lea.hbm %s1811_s2, %s998_s30  ;;  %s188_s7 = scalar_lea.vmem [#allocation2], %s987_s29 }
  0x15   : > { %s197_s8 = sshll.u32 %s188_s7, 4  ;;  %p1335_p0 = pnand %p1060_p13, %p1301_p4  ;;  %s1331_s8 = int_to_ptr.vmem [resolvable:$true] %s197_s8 }
  0x16   : > { %s1340_s10 = scalar_lea.sflag [#allocation3], %s184_s28  ;;  %s1118_s11 = scalar_lea.hbm %s1329_s6, 4096 }
  0x17   : > { %p1119_p2 = scmp.ne.s32.totalorder %s1329_s6, %s1118_s11  ;;  %p1120_p3 = pneg %p1335_p0 }
  0x18   : > { %s1123_s21 = scalar_lea.hbm %s1811_s2, 8192  ;;  %p1124_p4 = scmp.lt.u32.totalorder %s1329_s6, %s1811_s2 }
  0x19   : > { %p1121_p5 = pnand %p1120_p3, %p1119_p2  ;;  %p1125_p7 = scmp.lt.u32.totalorder %s1123_s21, %s1118_s11 }
  0x1a   : > { %p1127_p13 = scmp.lt.u32.totalorder %s1118_s11, %s1329_s6 }
  0x1b   : > { %p1122_p6 = pneg %p1121_p5  ;;  %p1126_p10 = por %p1125_p7, %p1124_p4 }
  0x1d   : > { %p1128_p12 = por %p1127_p13, %p1126_p10 }
  0x1f   : > { %p1129_p1 = pnand %p1128_p12, %p1122_p6 }
  0x21   : > { %1132 = shalt.err (!%p1129_p1)
}
  0x22   : > { %s1133_s28 = scalar_lea.vmem %s1331_s8, 4096  ;;  %s1232_s29 = smov [#allocation2]  }
  0x23   : > { %p1134_p2 = scmp.ne.s32.totalorder %s1331_s8, %s1133_s28  ;;  %s1138_s30 = sshll.u32 %s1232_s29, 4  ;;  %s1139_s30 = int_to_ptr.vmem [resolvable:$false] %s1138_s30 }
  0x24   : > { %s1140_s4 = scalar_lea.vmem %s1139_s30, 8192  ;;  %p1141_p9 = scmp.lt.s32.totalorder %s1331_s8, %s1139_s30 }
  0x25   : > { %p1136_p5 = pnand %p1134_p2, %p1120_p3  ;;  %p1142_p4 = scmp.lt.s32.totalorder %s1140_s4, %s1133_s28 }
  0x27   : > { %p1137_p11 = pneg %p1136_p5  ;;  %p1143_p7 = por %p1142_p4, %p1141_p9 }
  0x29   : > { %p1144_p10 = pnand %p1143_p7, %p1137_p11 }
  0x2b   : > { %1147 = shalt.err (!%p1144_p10)
}
  0x2c   : > { %s1233_s5 = smov 256   ;;  %s1234_s7 = smov 16  }
  0x2d   : > { %1055 = dma.hbm_to_vmem [thread:$0]  (!%p1335_p0), %s1329_s6, 4096, %s1331_s8, %s1340_s10, %s1233_s5, %s1233_s5, %s1234_s7  }
  0x2e   : > { %p205_p12 = scmp.lt.s32.totalorder %s1230_s17, 3  ;;  %p1819_p1 = scmp.ge.s32.totalorder %s1230_s17, 1 }
  0x30   : > { %p206_p3 = pnand %p1819_p1, %p205_p12 }
  0x31   : > { %s1372_s11 = sand.u32 (!%p206_p3), 1, %s1214_s13  }
  0x32   : > { %209 = sbr.rel (%p206_p3) target bundleno = 383 (0x17f), region = 32  ;;  %s991_s18 = sshll.u32 (!%p206_p3), %s1372_s11, 8 }
  0x33   : > { %s212_s19 = scalar_lea.sflag (!%p206_p3), [#allocation3], %s1372_s11  ;;  %s1376_s21 = scalar_lea.vmem (!%p206_p3), [#allocation2], %s991_s18 }
  0x39   : > { %1201 = dma.done.wait (%p1307_p8), %s212_s19, 4096  }
  0x3a   : > { %1203 = vsyncadd (%p1307_p8), %s212_s19, 4294963200  ;;  %v1235_v0 = vmov 0.0   ;;  %v1236_v1 = vmov 0   ;;  %v296_v2 = vld [vmem:[%s1376_s21 + $0x8] sm:$0xff]  ;;  %v298_v3 = vld [vmem:[%s1376_s21 + $0x18] sm:$0xff]  ;;  %s992_s6 = sshll.u32 %s1372_s11, 9 }
  0x3b   : > { %583 = vmatprep.mubr.f32.mxu0 %v1235_v0  ;;  %679 = vmatprep.mubr.f32.mxu1 %v1235_v0  ;;  %v295_v4 = vld [vmem:[%s1376_s21] sm:$0xff]  ;;  %v1000_v5 = vpack.c.bf16 %v298_v3, %v296_v2  ;;  %v297_v6 = vld [vmem:[%s1376_s21 + $0x10] sm:$0xff]  ;;  %v300_v7 = vld [vmem:[%s1376_s21 + $0x28] sm:$0xff]  ;;  %s1663_s8 = scalar_lea.vmem [#allocation5], %s992_s6  ;;  %s841_s23 = scalar_lea.sflag [#allocation4], %s1372_s11 }
  0x3c   : > { %1117 = vset.pattern.permute.xlu1 %v1236_v1  ;;  %1116 = vset.pattern.permute.xlu0 %v1236_v1  ;;  %v302_v8 = vld [vmem:[%s1376_s21 + $0x38] sm:$0xff]  ;;  %v1002_v9 = vpack.c.bf16 %v297_v6, %v295_v4  ;;  %v299_v11 = vld [vmem:[%s1376_s21 + $0x20] sm:$0xff]  ;;  %v301_v12 = vld [vmem:[%s1376_s21 + $0x30] sm:$0xff]  ;;  %s859_s9 = sshll.u32 %s1663_s8, 4  ;;  %p1820_p9 = scmp.ne.s32.totalorder %s1816_s25, 0  ;;  %s1755_s9 = int_to_ptr.vmem [resolvable:$true] %s859_s9 }
  0x3d   : > { %v1004_v10 = vpack.c.bf16 %v302_v8, %v300_v7  ;;  %v304_v13 = vld [vmem:[%s1376_s21 + $0x48] sm:$0xff]  ;;  %1001 = vmatprep.subr.bf16.mxu0 %v1000_v5  ;;  %1032 = vmatprep.subr.bf16.mxu1 %v1000_v5  ;;  %v306_v14 = vld [vmem:[%s1376_s21 + $0x58] sm:$0xff]  ;;  %v1006_v15 = vpack.c.bf16 %v301_v12, %v299_v11  ;;  %v303_v17 = vld [vmem:[%s1376_s21 + $0x40] sm:$0xff]  ;;  %s1148_s28 = scalar_lea.vmem %s1755_s9, 8192  ;;  %s1237_s29 = smov [#allocation5]  }
  0x3e   : > { %1003 = vmatpush1.bf16.msra.mxu0 %v1002_v9  ;;  %1040 = vmatpush1.bf16.msra.mxu1 %v1002_v9  ;;  %v1008_v16 = vpack.c.bf16 %v306_v14, %v304_v13  ;;  %v305_v18 = vld [vmem:[%s1376_s21 + $0x50] sm:$0xff]  ;;  %v308_v19 = vld [vmem:[%s1376_s21 + $0x68] sm:$0xff]  ;;  %v310_v20 = vld [vmem:[%s1376_s21 + $0x78] sm:$0xff]  ;;  %p1149_p8 = scmp.ne.s32.totalorder %s1755_s9, %s1148_s28  ;;  %s1152_s30 = sshll.u32 %s1237_s29, 4  ;;  %s1153_s30 = int_to_ptr.vmem [resolvable:$false] %s1152_s30 }
  0x3f   : > { %1005 = vmatprep.subr.bf16.mxu0 %v1004_v10  ;;  %1033 = vmatprep.subr.bf16.mxu1 %v1004_v10  ;;  %v1010_v21 = vpack.c.bf16 %v305_v18, %v303_v17  ;;  %v1012_v22 = vpack.c.bf16 %v310_v20, %v308_v19  ;;  %v307_v23 = vld [vmem:[%s1376_s21 + $0x60] sm:$0xff]  ;;  %v309_v24 = vld [vmem:[%s1376_s21 + $0x70] sm:$0xff]  ;;  %v312_v25 = vld [vmem:[%s1376_s21 + $0x88] sm:$0xff]  ;;  %s1154_s4 = scalar_lea.vmem %s1153_s30, 16384  ;;  %p1155_p6 = scmp.lt.s32.totalorder %s1755_s9, %s1153_s30 }
  0x40   : > { %v314_v26 = vld [vmem:[%s1376_s21 + $0x98] sm:$0xff]  ;;  %v1014_v27 = vpack.c.bf16 %v309_v24, %v307_v23  ;;  %v311_v29 = vld [vmem:[%s1376_s21 + $0x80] sm:$0xff]  ;;  %v313_v30 = vld [vmem:[%s1376_s21 + $0x90] sm:$0xff]  ;;  %p1150_p11 = pnand %p1149_p8, %p1820_p9  ;;  %p1156_p13 = scmp.lt.s32.totalorder %s1154_s4, %s1148_s28 }
  0x41   : > { %v1016_v28 = vpack.c.bf16 %v314_v26, %v312_v25  ;;  %v316_v31 = vld [vmem:[%s1376_s21 + $0xa8] sm:$0xff]  ;;  %v318_v32 = vld [vmem:[%s1376_s21 + $0xb8] sm:$0xff]  ;;  %v329_v33 = vld [vmem:[%s1810_s1 + $0x10] sm:$0xff]  ;;  %v1018_v35 = vpack.c.bf16 %v313_v30, %v311_v29 }
  0x42   : > { %1007 = vmatpush1.bf16.msra.mxu0 %v1006_v15  ;;  %1041 = vmatpush1.bf16.msra.mxu1 %v1006_v15  ;;  %v327_v34 = vld [vmem:[%s1810_s1] sm:$0xff]  ;;  %v1020_v36 = vpack.c.bf16 %v318_v32, %v316_v31  ;;  %v317_v38 = vld [vmem:[%s1376_s21 + $0xb0] sm:$0xff]  ;;  %v320_v39 = vld [vmem:[%s1376_s21 + $0xc8] sm:$0xff]  ;;  %p1151_p0 = pneg %p1150_p11  ;;  %p1157_p2 = por %p1156_p13, %p1155_p6 }
  0x43   : > { %1009 = vmatprep.subr.bf16.mxu0 %v1008_v16  ;;  %1034 = vmatprep.subr.bf16.mxu1 %v1008_v16  ;;  %v315_v37 = vld [vmem:[%s1376_s21 + $0xa0] sm:$0xff]  ;;  %v322_v40 = vld [vmem:[%s1376_s21 + $0xd8] sm:$0xff]  ;;  %v328_v42 = vld [vmem:[%s1810_s1 + $0x8] sm:$0xff] }
  0x44   : > { %371 = vperm.xlu1 %1117, %v329_v33   ;;  %361 = vperm.xlu0 %1116, %v327_v34   ;;  %v330_v41 = vld [vmem:[%s1810_s1 + $0x18] sm:$0xff]  ;;  %v1022_v43 = vpack.c.bf16 %v317_v38, %v315_v37  ;;  %v1024_v44 = vpack.c.bf16 %v322_v40, %v320_v39  ;;  %v319_v45 = vld [vmem:[%s1376_s21 + $0xc0] sm:$0xff]  ;;  %v321_v46 = vld [vmem:[%s1376_s21 + $0xd0] sm:$0xff]  ;;  %p1158_p5 = pnand %p1157_p2, %p1151_p0 }
  0x45   : > { %v324_v47 = vld [vmem:[%s1376_s21 + $0xe8] sm:$0xff]  ;;  %v326_v48 = vld [vmem:[%s1376_s21 + $0xf8] sm:$0xff]  ;;  %v331_v50 = vld [vmem:[%s1810_s1 + $0x20] sm:$0xff]  ;;  %v1026_v51 = vpack.c.bf16 %v321_v46, %v319_v45 }
  0x46   : > { %1011 = vmatpush1.bf16.msra.mxu0 %v1010_v21  ;;  %1042 = vmatpush1.bf16.msra.mxu1 %v1010_v21  ;;  %v332_v49 = vld [vmem:[%s1810_s1 + $0x28] sm:$0xff]  ;;  %v1028_v52 = vpack.c.bf16 %v326_v48, %v324_v47  ;;  %v323_v53 = vld [vmem:[%s1376_s21 + $0xe0] sm:$0xff]  ;;  %v325_v54 = vld [vmem:[%s1376_s21 + $0xf0] sm:$0xff]  ;;  %s999_s21 = sshll.u32 %s1222_s15, 13 }
  0x47   : > { %1013 = vmatprep.subr.bf16.mxu0 %v1012_v22  ;;  %1035 = vmatprep.subr.bf16.mxu1 %v1012_v22  ;;  %v334_v55 = vld [vmem:[%s1810_s1 + $0x38] sm:$0xff]  ;;  %v333_v56 = vld [vmem:[%s1810_s1 + $0x30] sm:$0xff]  ;;  %v1030_v57 = vpack.c.bf16 %v325_v54, %v323_v53  ;;  %v336_v58 = vld [vmem:[%s1810_s1 + $0x48] sm:$0xff]  ;;  %s1753_s22 = scalar_lea.hbm %s1812_s3, %s999_s21 }
  0x48   : > { %376 = vperm.xlu1 %1117, %v330_v41   ;;  %366 = vperm.xlu0 %1116, %v328_v42   ;;  %v335_v59 = vld [vmem:[%s1810_s1 + $0x40] sm:$0xff]  ;;  %v338_v62 = vld [vmem:[%s1810_s1 + $0x58] sm:$0xff]  ;;  %v337_v63 = vld [vmem:[%s1810_s1 + $0x50] sm:$0xff] }
  0x49   : > { %v263_v60 = vld [vmem:[%s1809_s0] sm:$0xff]  ;;  %v264_v1 = vld [vmem:[%s1809_s0 + $0x8] sm:$0xff]  ;;  %v265_v5 = vld [vmem:[%s1809_s0 + $0x10] sm:$0xff] }
  0x4a   : > { %1015 = vmatpush1.bf16.msra.mxu0 %v1014_v27  ;;  %1043 = vmatpush1.bf16.msra.mxu1 %v1014_v27  ;;  %v279_v61 = vld [vmem:[%s1809_s0 + $0x80] sm:$0xff]  ;;  %v280_v2 = vld [vmem:[%s1809_s0 + $0x88] sm:$0xff]  ;;  %v281_v6 = vld [vmem:[%s1809_s0 + $0x90] sm:$0xff] }
  0x4b   : > { %1017 = vmatprep.subr.bf16.mxu0 %v1016_v28  ;;  %1036 = vmatprep.subr.bf16.mxu1 %v1016_v28  ;;  %v340_v3 = vld [vmem:[%s1810_s1 + $0x68] sm:$0xff]  ;;  %v339_v4 = vld [vmem:[%s1810_s1 + $0x60] sm:$0xff]  ;;  %v342_v7 = vld [vmem:[%s1810_s1 + $0x78] sm:$0xff] }
  0x4c   : > { %386 = vperm.xlu1 %1117, %v332_v49   ;;  %381 = vperm.xlu0 %1116, %v331_v50   ;;  %v341_v8 = vld [vmem:[%s1810_s1 + $0x70] sm:$0xff]  ;;  %v266_v9 = vld [vmem:[%s1809_s0 + $0x18] sm:$0xff]  ;;  %v344_v11 = vld [vmem:[%s1810_s1 + $0x88] sm:$0xff] }
  0x4d   : > { %v282_v10 = vld [vmem:[%s1809_s0 + $0x98] sm:$0xff]  ;;  %v343_v12 = vld [vmem:[%s1810_s1 + $0x80] sm:$0xff]  ;;  %v345_v16 = vld [vmem:[%s1810_s1 + $0x90] sm:$0xff] }
  0x4e   : > { %1019 = vmatpush1.bf16.msra.mxu0 %v1018_v35  ;;  %1044 = vmatpush1.bf16.msra.mxu1 %v1018_v35  ;;  %v267_v13 = vld [vmem:[%s1809_s0 + $0x20] sm:$0xff]  ;;  %v346_v15 = vld [vmem:[%s1810_s1 + $0x98] sm:$0xff]  ;;  %v268_v17 = vld [vmem:[%s1809_s0 + $0x28] sm:$0xff] }
  0x4f   : > { %1021 = vmatprep.subr.bf16.mxu0 %v1020_v36  ;;  %1037 = vmatprep.subr.bf16.mxu1 %v1020_v36  ;;  %v283_v14 = vld [vmem:[%s1809_s0 + $0xa0] sm:$0xff]  ;;  %v284_v18 = vld [vmem:[%s1809_s0 + $0xa8] sm:$0xff]  ;;  %v269_v21 = vld [vmem:[%s1809_s0 + $0x30] sm:$0xff] }
  0x50   : > { %396 = vperm.xlu1 %1117, %v334_v55   ;;  %391 = vperm.xlu0 %1116, %v333_v56   ;;  %v348_v19 = vld [vmem:[%s1810_s1 + $0xa8] sm:$0xff]  ;;  %v347_v20 = vld [vmem:[%s1810_s1 + $0xa0] sm:$0xff]  ;;  %v285_v22 = vld [vmem:[%s1809_s0 + $0xb0] sm:$0xff] }
  0x51   : > { %v350_v23 = vld [vmem:[%s1810_s1 + $0xb8] sm:$0xff]  ;;  %v349_v24 = vld [vmem:[%s1810_s1 + $0xb0] sm:$0xff]  ;;  %v352_v27 = vld [vmem:[%s1810_s1 + $0xc8] sm:$0xff] }
  0x52   : > { %1023 = vmatpush1.bf16.msra.mxu0 %v1022_v43  ;;  %1045 = vmatpush1.bf16.msra.mxu1 %v1022_v43  ;;  %v270_v25 = vld [vmem:[%s1809_s0 + $0x38] sm:$0xff]  ;;  %v351_v28 = vld [vmem:[%s1810_s1 + $0xc0] sm:$0xff]  ;;  %v353_v32 = vld [vmem:[%s1810_s1 + $0xd0] sm:$0xff] }
  0x53   : > { %1025 = vmatprep.subr.bf16.mxu0 %v1024_v44  ;;  %1038 = vmatprep.subr.bf16.mxu1 %v1024_v44  ;;  %v286_v26 = vld [vmem:[%s1809_s0 + $0xb8] sm:$0xff]  ;;  %v271_v29 = vld [vmem:[%s1809_s0 + $0x40] sm:$0xff]  ;;  %v272_v33 = vld [vmem:[%s1809_s0 + $0x48] sm:$0xff] }
  0x54   : > { %406 = vperm.xlu1 %1117, %v336_v58   ;;  %401 = vperm.xlu0 %1116, %v335_v59   ;;  %v287_v30 = vld [vmem:[%s1809_s0 + $0xc0] sm:$0xff]  ;;  %v354_v31 = vld [vmem:[%s1810_s1 + $0xd8] sm:$0xff]  ;;  %v288_v34 = vld [vmem:[%s1809_s0 + $0xc8] sm:$0xff] }
  0x55   : > { %v356_v35 = vld [vmem:[%s1810_s1 + $0xe8] sm:$0xff]  ;;  %v355_v36 = vld [vmem:[%s1810_s1 + $0xe0] sm:$0xff]  ;;  %v273_v37 = vld [vmem:[%s1809_s0 + $0x50] sm:$0xff] }
  0x56   : > { %1027 = vmatpush1.bf16.msra.mxu0 %v1026_v51  ;;  %1046 = vmatpush1.bf16.msra.mxu1 %v1026_v51  ;;  %v289_v38 = vld [vmem:[%s1809_s0 + $0xd0] sm:$0xff]  ;;  %v358_v39 = vld [vmem:[%s1810_s1 + $0xf8] sm:$0xff]  ;;  %v275_v43 = vld [vmem:[%s1809_s0 + $0x60] sm:$0xff] }
  0x57   : > { %1029 = vmatprep.subr.bf16.mxu0 %v1028_v52  ;;  %1039 = vmatprep.subr.bf16.mxu1 %v1028_v52  ;;  %v357_v40 = vld [vmem:[%s1810_s1 + $0xf0] sm:$0xff]  ;;  %v274_v41 = vld [vmem:[%s1809_s0 + $0x58] sm:$0xff]  ;;  %v291_v44 = vld [vmem:[%s1809_s0 + $0xe0] sm:$0xff] }
  0x58   : > { %416 = vperm.xlu1 %1117, %v338_v62   ;;  %411 = vperm.xlu0 %1116, %v337_v63   ;;  %v290_v42 = vld [vmem:[%s1809_s0 + $0xd8] sm:$0xff]  ;;  %v276_v45 = vld [vmem:[%s1809_s0 + $0x68] sm:$0xff]  ;;  %v277_v47 = vld [vmem:[%s1809_s0 + $0x70] sm:$0xff] }
  0x59   : > { %v292_v46 = vld [vmem:[%s1809_s0 + $0xe8] sm:$0xff]  ;;  %v293_v48 = vld [vmem:[%s1809_s0 + $0xf0] sm:$0xff]  ;;  %v278_v49 = vld [vmem:[%s1809_s0 + $0x78] sm:$0xff] }
  0x5a   : > { %1031 = vmatpush1.bf16.msra.mxu0 %v1030_v57  ;;  %1047 = vmatpush1.bf16.msra.mxu1 %v1030_v57  ;;  %v294_v50 = vld [vmem:[%s1809_s0 + $0xf8] sm:$0xff] }
  0x5c   : > { %426 = vperm.xlu1 %1117, %v340_v3   ;;  %421 = vperm.xlu0 %1116, %v339_v4  }
  0x5d   : > { %584 = vmatmul.mubr.f32.vlgmr.msra.gmra.mrb[0].mxu0 %v263_v60  ;;  %680 = vmatmul.mubr.f32.vlgmr.msra.gmra.mrb[0].mxu1 %v279_v61 }
  0x5e   : > { %589 = vmatprep.mubr.f32.mxu0 %v1235_v0  ;;  %685 = vmatprep.mubr.f32.mxu1 %v1235_v0 }
  0x60   : > { %436 = vperm.xlu1 %1117, %v342_v7   ;;  %431 = vperm.xlu0 %1116, %v341_v8  }
  0x61   : > { %590 = vmatmul.mubr.f32.gmra.mrb[2].mxu0 %v264_v1  ;;  %686 = vmatmul.mubr.f32.gmra.mrb[2].mxu1 %v280_v2 }
  0x62   : > { %595 = vmatprep.mubr.f32.mxu0 %v1235_v0  ;;  %691 = vmatprep.mubr.f32.mxu1 %v1235_v0 }
  0x64   : > { %446 = vperm.xlu1 %1117, %v344_v11   ;;  %441 = vperm.xlu0 %1116, %v343_v12  }
  0x65   : > { %596 = vmatmul.mubr.f32.gmra.mrb[4].mxu0 %v265_v5  ;;  %692 = vmatmul.mubr.f32.gmra.mrb[4].mxu1 %v281_v6 }
  0x66   : > { %601 = vmatprep.mubr.f32.mxu0 %v1235_v0  ;;  %697 = vmatprep.mubr.f32.mxu1 %v1235_v0 }
  0x68   : > { %456 = vperm.xlu1 %1117, %v346_v15   ;;  %451 = vperm.xlu0 %1116, %v345_v16  }
  0x69   : > { %602 = vmatmul.mubr.f32.gmra.mrb[6].mxu0 %v266_v9  ;;  %698 = vmatmul.mubr.f32.gmra.mrb[6].mxu1 %v282_v10 }
  0x6a   : > { %607 = vmatprep.mubr.f32.mxu0 %v1235_v0  ;;  %703 = vmatprep.mubr.f32.mxu1 %v1235_v0 }
  0x6c   : > { %466 = vperm.xlu1 %1117, %v348_v19   ;;  %461 = vperm.xlu0 %1116, %v347_v20  }
  0x6d   : > { %608 = vmatmul.mubr.f32.gmra.mrb[8].mxu0 %v267_v13  ;;  %704 = vmatmul.mubr.f32.gmra.mrb[8].mxu1 %v283_v14 }
  0x6e   : > { %613 = vmatprep.mubr.f32.mxu0 %v1235_v0  ;;  %709 = vmatprep.mubr.f32.mxu1 %v1235_v0 }
  0x70   : > { %476 = vperm.xlu1 %1117, %v350_v23   ;;  %471 = vperm.xlu0 %1116, %v349_v24  }
  0x71   : > { %614 = vmatmul.mubr.f32.gmra.mrb[10].mxu0 %v268_v17  ;;  %710 = vmatmul.mubr.f32.gmra.mrb[10].mxu1 %v284_v18 }
  0x72   : > { %619 = vmatprep.mubr.f32.mxu0 %v1235_v0  ;;  %715 = vmatprep.mubr.f32.mxu1 %v1235_v0 }
  0x74   : > { %486 = vperm.xlu1 %1117, %v352_v27   ;;  %481 = vperm.xlu0 %1116, %v351_v28  }
  0x75   : > { %620 = vmatmul.mubr.f32.gmra.mrb[12].mxu0 %v269_v21  ;;  %716 = vmatmul.mubr.f32.gmra.mrb[12].mxu1 %v285_v22 }
  0x76   : > { %625 = vmatprep.mubr.f32.mxu0 %v1235_v0  ;;  %721 = vmatprep.mubr.f32.mxu1 %v1235_v0 }
  0x78   : > { %496 = vperm.xlu1 %1117, %v354_v31   ;;  %491 = vperm.xlu0 %1116, %v353_v32  }
  0x79   : > { %626 = vmatmul.mubr.f32.gmra.mrb[14].mxu0 %v270_v25  ;;  %722 = vmatmul.mubr.f32.gmra.mrb[14].mxu1 %v286_v26 }
  0x7a   : > { %631 = vmatprep.mubr.f32.mxu0 %v1235_v0  ;;  %727 = vmatprep.mubr.f32.mxu1 %v1235_v0 }
  0x7c   : > { %506 = vperm.xlu1 %1117, %v356_v35   ;;  %501 = vperm.xlu0 %1116, %v355_v36  }
  0x7d   : > { %632 = vmatmul.mubr.f32.gmra.mrb[16].mxu0 %v271_v29  ;;  %728 = vmatmul.mubr.f32.gmra.mrb[16].mxu1 %v287_v30 }
  0x7e   : > { %637 = vmatprep.mubr.f32.mxu0 %v1235_v0  ;;  %733 = vmatprep.mubr.f32.mxu1 %v1235_v0 }
  0x80   : > { %516 = vperm.xlu1 %1117, %v358_v39   ;;  %511 = vperm.xlu0 %1116, %v357_v40  }
  0x81   : > { %638 = vmatmul.mubr.f32.gmra.mrb[18].mxu0 %v272_v33  ;;  %734 = vmatmul.mubr.f32.gmra.mrb[18].mxu1 %v288_v34 }
  0x82   : > { %643 = vmatprep.mubr.f32.mxu0 %v1235_v0  ;;  %739 = vmatprep.mubr.f32.mxu1 %v1235_v0 }
  0x85   : > { %644 = vmatmul.mubr.f32.gmra.mrb[20].mxu0 %v273_v37  ;;  %740 = vmatmul.mubr.f32.gmra.mrb[20].mxu1 %v289_v38 }
  0x86   : > { %649 = vmatprep.mubr.f32.mxu0 %v1235_v0  ;;  %745 = vmatprep.mubr.f32.mxu1 %v1235_v0 }
  0x89   : > { %650 = vmatmul.mubr.f32.gmra.mrb[22].mxu0 %v274_v41  ;;  %746 = vmatmul.mubr.f32.gmra.mrb[22].mxu1 %v290_v42 }
  0x8a   : > { %655 = vmatprep.mubr.f32.mxu0 %v1235_v0  ;;  %751 = vmatprep.mubr.f32.mxu1 %v1235_v0 }
  0x8d   : > { %656 = vmatmul.mubr.f32.gmra.mrb[24].mxu0 %v275_v43  ;;  %752 = vmatmul.mubr.f32.gmra.mrb[24].mxu1 %v291_v44 }
  0x8e   : > { %661 = vmatprep.mubr.f32.mxu0 %v1235_v0  ;;  %757 = vmatprep.mubr.f32.mxu1 %v1235_v0 }
  0x91   : > { %662 = vmatmul.mubr.f32.gmra.mrb[26].mxu0 %v276_v45  ;;  %758 = vmatmul.mubr.f32.gmra.mrb[26].mxu1 %v292_v46 }
  0x92   : > { %667 = vmatprep.mubr.f32.mxu0 %v1235_v0  ;;  %763 = vmatprep.mubr.f32.mxu1 %v1235_v0 }
  0x95   : > { %668 = vmatmul.mubr.f32.gmra.mrb[28].mxu0 %v277_v47  ;;  %764 = vmatmul.mubr.f32.gmra.mrb[28].mxu1 %v293_v48 }
  0x96   : > { %673 = vmatprep.mubr.f32.mxu0 %v1235_v0  ;;  %769 = vmatprep.mubr.f32.mxu1 %v1235_v0 }
  0x99   : > { %674 = vmatmul.mubr.f32.gmra.mrb[30].mxu0 %v278_v49  ;;  %770 = vmatmul.mubr.f32.gmra.mrb[30].mxu1 %v294_v50 }
  0xc3   : > { %v362_v51 = vpop.permute.xlu0 %361  ;;  %v372_v52 = vpop.permute.xlu1 %371 }
  0xc7   : > { %v367_v53 = vpop.permute.xlu0 %366  ;;  %v377_v54 = vpop.permute.xlu1 %376 }
  0xcb   : > { %v1638_v55 = vpop.permute.xlu0 %381  ;;  %v1640_v56 = vpop.permute.xlu1 %386 }
  0xcf   : > { %v1642_v0 = vpop.permute.xlu0 %391  ;;  %v1644_v57 = vpop.permute.xlu1 %396 }
  0xd3   : > { %v1646_v58 = vpop.permute.xlu0 %401  ;;  %v1648_v59 = vpop.permute.xlu1 %406 }
  0xd7   : > { %v1650_v60 = vpop.permute.xlu0 %411  ;;  %v1652_v61 = vpop.permute.xlu1 %416 }
  0xdb   : > { %v1654_v62 = vpop.permute.xlu0 %421  ;;  %v1656_v63 = vpop.permute.xlu1 %426 }
  0xdf   : > { %v1658_v1 = vpop.permute.xlu0 %431  ;;  %v1660_v2 = vpop.permute.xlu1 %436 }
  0xe3   : > { %v442_v3 = vpop.permute.xlu0 %441  ;;  %v447_v12 = vpop.permute.xlu1 %446 }
  0xe7   : > { %v452_v21 = vpop.permute.xlu0 %451  ;;  %v457_v30 = vpop.permute.xlu1 %456 }
  0xeb   : > { %v462_v39 = vpop.permute.xlu0 %461  ;;  %v467_v48 = vpop.permute.xlu1 %466 }
 0x130   : > { %v585_v4 = vpop.f32.mrb[0].mxu0  ;;  %v681_v5 = vpop.f32.mrb[0].mxu1 }
 0x131   : > { %v586_v6 = vadd.f32 %v585_v4, %v362_v51  ;;  %v682_v7 = vadd.f32 %v681_v5, %v442_v3  ;;  %v587_v8 = vpop.f32.mrb[1].mxu0  ;;  %v683_v9 = vpop.f32.mrb[1].mxu1 }
 0x132   : > { %v588_v10 = vadd.f32 %v587_v8, %v362_v51  ;;  %v684_v11 = vadd.f32 %v683_v9, %v442_v3  ;;  %v472_v4 = vpop.permute.xlu0 %471 }
 0x133   : > { %776 = vst [vmem:[%s1663_s8] sm:$0xff] %v586_v6  ;;  %808 = vst [vmem:[%s1663_s8 + $0x100] sm:$0xff] %v682_v7 }
 0x134   : > { %777 = vst [vmem:[%s1663_s8 + $0x8] sm:$0xff] %v588_v10  ;;  %809 = vst [vmem:[%s1663_s8 + $0x108] sm:$0xff] %v684_v11  ;;  %v591_v13 = vpop.f32.mrb[2].mxu0  ;;  %v687_v14 = vpop.f32.mrb[2].mxu1 }
 0x135   : > { %v592_v15 = vadd.f32 %v591_v13, %v367_v53  ;;  %v688_v16 = vadd.f32 %v687_v14, %v447_v12  ;;  %v593_v17 = vpop.f32.mrb[3].mxu0  ;;  %v689_v18 = vpop.f32.mrb[3].mxu1 }
 0x136   : > { %v594_v19 = vadd.f32 %v593_v17, %v367_v53  ;;  %v690_v20 = vadd.f32 %v689_v18, %v447_v12  ;;  %v477_v12 = vpop.permute.xlu1 %476 }
 0x137   : > { %778 = vst [vmem:[%s1663_s8 + $0x10] sm:$0xff] %v592_v15  ;;  %810 = vst [vmem:[%s1663_s8 + $0x110] sm:$0xff] %v688_v16 }
 0x138   : > { %779 = vst [vmem:[%s1663_s8 + $0x18] sm:$0xff] %v594_v19  ;;  %811 = vst [vmem:[%s1663_s8 + $0x118] sm:$0xff] %v690_v20  ;;  %v597_v22 = vpop.f32.mrb[4].mxu0  ;;  %v693_v23 = vpop.f32.mrb[4].mxu1 }
 0x139   : > { %v598_v24 = vadd.f32 %v597_v22, %v372_v52  ;;  %v694_v25 = vadd.f32 %v693_v23, %v452_v21  ;;  %v599_v26 = vpop.f32.mrb[5].mxu0  ;;  %v695_v27 = vpop.f32.mrb[5].mxu1 }
 0x13a   : > { %v600_v28 = vadd.f32 %v599_v26, %v372_v52  ;;  %v696_v29 = vadd.f32 %v695_v27, %v452_v21  ;;  %v482_v20 = vpop.permute.xlu0 %481 }
 0x13b   : > { %780 = vst [vmem:[%s1663_s8 + $0x20] sm:$0xff] %v598_v24  ;;  %812 = vst [vmem:[%s1663_s8 + $0x120] sm:$0xff] %v694_v25 }
 0x13c   : > { %781 = vst [vmem:[%s1663_s8 + $0x28] sm:$0xff] %v600_v28  ;;  %813 = vst [vmem:[%s1663_s8 + $0x128] sm:$0xff] %v696_v29  ;;  %v603_v31 = vpop.f32.mrb[6].mxu0  ;;  %v699_v32 = vpop.f32.mrb[6].mxu1 }
 0x13d   : > { %v604_v33 = vadd.f32 %v603_v31, %v377_v54  ;;  %v700_v34 = vadd.f32 %v699_v32, %v457_v30  ;;  %v605_v35 = vpop.f32.mrb[7].mxu0  ;;  %v701_v36 = vpop.f32.mrb[7].mxu1 }
 0x13e   : > { %v606_v37 = vadd.f32 %v605_v35, %v377_v54  ;;  %v702_v38 = vadd.f32 %v701_v36, %v457_v30  ;;  %v487_v28 = vpop.permute.xlu1 %486  ;;  %v492_v36 = vpop.permute.xlu0 %491 }
 0x13f   : > { %782 = vst [vmem:[%s1663_s8 + $0x30] sm:$0xff] %v604_v33  ;;  %814 = vst [vmem:[%s1663_s8 + $0x130] sm:$0xff] %v700_v34 }
 0x140   : > { %783 = vst [vmem:[%s1663_s8 + $0x38] sm:$0xff] %v606_v37  ;;  %815 = vst [vmem:[%s1663_s8 + $0x138] sm:$0xff] %v702_v38  ;;  %v609_v40 = vpop.f32.mrb[8].mxu0  ;;  %v705_v41 = vpop.f32.mrb[8].mxu1 }
 0x141   : > { %v610_v42 = vadd.f32 %v609_v40, %v1638_v55  ;;  %v706_v43 = vadd.f32 %v705_v41, %v462_v39  ;;  %v611_v44 = vpop.f32.mrb[9].mxu0  ;;  %v707_v45 = vpop.f32.mrb[9].mxu1 }
 0x142   : > { %v612_v46 = vadd.f32 %v611_v44, %v1638_v55  ;;  %v708_v47 = vadd.f32 %v707_v45, %v462_v39  ;;  %v497_v44 = vpop.permute.xlu1 %496 }
 0x143   : > { %784 = vst [vmem:[%s1663_s8 + $0x40] sm:$0xff] %v610_v42  ;;  %816 = vst [vmem:[%s1663_s8 + $0x140] sm:$0xff] %v706_v43 }
 0x144   : > { %785 = vst [vmem:[%s1663_s8 + $0x48] sm:$0xff] %v612_v46  ;;  %817 = vst [vmem:[%s1663_s8 + $0x148] sm:$0xff] %v708_v47  ;;  %v615_v49 = vpop.f32.mrb[10].mxu0  ;;  %v711_v50 = vpop.f32.mrb[10].mxu1 }
 0x145   : > { %v616_v51 = vadd.f32 %v615_v49, %v1640_v56  ;;  %v712_v52 = vadd.f32 %v711_v50, %v467_v48  ;;  %v617_v53 = vpop.f32.mrb[11].mxu0  ;;  %v713_v54 = vpop.f32.mrb[11].mxu1 }
 0x146   : > { %v618_v3 = vadd.f32 %v617_v53, %v1640_v56  ;;  %v714_v55 = vadd.f32 %v713_v54, %v467_v48 }
 0x147   : > { %786 = vst [vmem:[%s1663_s8 + $0x50] sm:$0xff] %v616_v51  ;;  %818 = vst [vmem:[%s1663_s8 + $0x150] sm:$0xff] %v712_v52  ;;  %v502_v52 = vpop.permute.xlu0 %501 }
 0x148   : > { %787 = vst [vmem:[%s1663_s8 + $0x58] sm:$0xff] %v618_v3  ;;  %819 = vst [vmem:[%s1663_s8 + $0x158] sm:$0xff] %v714_v55  ;;  %v621_v5 = vpop.f32.mrb[12].mxu0  ;;  %v717_v6 = vpop.f32.mrb[12].mxu1 }
 0x149   : > { %v622_v7 = vadd.f32 %v621_v5, %v1642_v0  ;;  %v718_v8 = vadd.f32 %v717_v6, %v472_v4  ;;  %v623_v9 = vpop.f32.mrb[13].mxu0  ;;  %v719_v10 = vpop.f32.mrb[13].mxu1 }
 0x14a   : > { %v624_v11 = vadd.f32 %v623_v9, %v1642_v0  ;;  %v720_v56 = vadd.f32 %v719_v10, %v472_v4 }
 0x14b   : > { %788 = vst [vmem:[%s1663_s8 + $0x60] sm:$0xff] %v622_v7  ;;  %820 = vst [vmem:[%s1663_s8 + $0x160] sm:$0xff] %v718_v8  ;;  %v507_v7 = vpop.permute.xlu1 %506 }
 0x14c   : > { %789 = vst [vmem:[%s1663_s8 + $0x68] sm:$0xff] %v624_v11  ;;  %821 = vst [vmem:[%s1663_s8 + $0x168] sm:$0xff] %v720_v56  ;;  %v627_v13 = vpop.f32.mrb[14].mxu0  ;;  %v723_v14 = vpop.f32.mrb[14].mxu1 }
 0x14d   : > { %v628_v15 = vadd.f32 %v627_v13, %v1644_v57  ;;  %v724_v16 = vadd.f32 %v723_v14, %v477_v12  ;;  %v629_v17 = vpop.f32.mrb[15].mxu0  ;;  %v725_v18 = vpop.f32.mrb[15].mxu1 }
 0x14e   : > { %v630_v19 = vadd.f32 %v629_v17, %v1644_v57  ;;  %v726_v0 = vadd.f32 %v725_v18, %v477_v12  ;;  %v512_v14 = vpop.permute.xlu0 %511 }
 0x14f   : > { %790 = vst [vmem:[%s1663_s8 + $0x70] sm:$0xff] %v628_v15  ;;  %822 = vst [vmem:[%s1663_s8 + $0x170] sm:$0xff] %v724_v16 }
 0x150   : > { %791 = vst [vmem:[%s1663_s8 + $0x78] sm:$0xff] %v630_v19  ;;  %823 = vst [vmem:[%s1663_s8 + $0x178] sm:$0xff] %v726_v0  ;;  %v633_v21 = vpop.f32.mrb[16].mxu0  ;;  %v729_v22 = vpop.f32.mrb[16].mxu1 }
 0x151   : > { %v634_v23 = vadd.f32 %v633_v21, %v1646_v58  ;;  %v730_v24 = vadd.f32 %v729_v22, %v482_v20  ;;  %v635_v25 = vpop.f32.mrb[17].mxu0  ;;  %v731_v26 = vpop.f32.mrb[17].mxu1 }
 0x152   : > { %v636_v27 = vadd.f32 %v635_v25, %v1646_v58  ;;  %v732_v57 = vadd.f32 %v731_v26, %v482_v20  ;;  %v517_v21 = vpop.permute.xlu1 %516 }
 0x153   : > { %792 = vst [vmem:[%s1663_s8 + $0x80] sm:$0xff] %v634_v23  ;;  %824 = vst [vmem:[%s1663_s8 + $0x180] sm:$0xff] %v730_v24 }
 0x154   : > { %793 = vst [vmem:[%s1663_s8 + $0x88] sm:$0xff] %v636_v27  ;;  %825 = vst [vmem:[%s1663_s8 + $0x188] sm:$0xff] %v732_v57  ;;  %v639_v29 = vpop.f32.mrb[18].mxu0  ;;  %v735_v30 = vpop.f32.mrb[18].mxu1 }
 0x155   : > { %v640_v31 = vadd.f32 %v639_v29, %v1648_v59  ;;  %v736_v32 = vadd.f32 %v735_v30, %v487_v28  ;;  %v641_v33 = vpop.f32.mrb[19].mxu0  ;;  %v737_v34 = vpop.f32.mrb[19].mxu1 }
 0x156   : > { %v642_v35 = vadd.f32 %v641_v33, %v1648_v59  ;;  %v738_v58 = vadd.f32 %v737_v34, %v487_v28 }
 0x157   : > { %794 = vst [vmem:[%s1663_s8 + $0x90] sm:$0xff] %v640_v31  ;;  %826 = vst [vmem:[%s1663_s8 + $0x190] sm:$0xff] %v736_v32 }
 0x158   : > { %795 = vst [vmem:[%s1663_s8 + $0x98] sm:$0xff] %v642_v35  ;;  %827 = vst [vmem:[%s1663_s8 + $0x198] sm:$0xff] %v738_v58  ;;  %v645_v37 = vpop.f32.mrb[20].mxu0  ;;  %v741_v38 = vpop.f32.mrb[20].mxu1 }
 0x159   : > { %v646_v39 = vadd.f32 %v645_v37, %v1650_v60  ;;  %v742_v40 = vadd.f32 %v741_v38, %v492_v36  ;;  %v647_v41 = vpop.f32.mrb[21].mxu0  ;;  %v743_v42 = vpop.f32.mrb[21].mxu1 }
 0x15a   : > { %v648_v43 = vadd.f32 %v647_v41, %v1650_v60  ;;  %v744_v59 = vadd.f32 %v743_v42, %v492_v36 }
 0x15b   : > { %796 = vst [vmem:[%s1663_s8 + $0xa0] sm:$0xff] %v646_v39  ;;  %828 = vst [vmem:[%s1663_s8 + $0x1a0] sm:$0xff] %v742_v40 }
 0x15c   : > { %797 = vst [vmem:[%s1663_s8 + $0xa8] sm:$0xff] %v648_v43  ;;  %829 = vst [vmem:[%s1663_s8 + $0x1a8] sm:$0xff] %v744_v59  ;;  %v651_v45 = vpop.f32.mrb[22].mxu0  ;;  %v747_v46 = vpop.f32.mrb[22].mxu1 }
 0x15d   : > { %v652_v47 = vadd.f32 %v651_v45, %v1652_v61  ;;  %v748_v48 = vadd.f32 %v747_v46, %v497_v44  ;;  %v653_v49 = vpop.f32.mrb[23].mxu0  ;;  %v749_v50 = vpop.f32.mrb[23].mxu1 }
 0x15e   : > { %v654_v51 = vadd.f32 %v653_v49, %v1652_v61  ;;  %v750_v60 = vadd.f32 %v749_v50, %v497_v44 }
 0x15f   : > { %798 = vst [vmem:[%s1663_s8 + $0xb0] sm:$0xff] %v652_v47  ;;  %830 = vst [vmem:[%s1663_s8 + $0x1b0] sm:$0xff] %v748_v48 }
 0x160   : > { %799 = vst [vmem:[%s1663_s8 + $0xb8] sm:$0xff] %v654_v51  ;;  %831 = vst [vmem:[%s1663_s8 + $0x1b8] sm:$0xff] %v750_v60  ;;  %v657_v53 = vpop.f32.mrb[24].mxu0  ;;  %v753_v54 = vpop.f32.mrb[24].mxu1 }
 0x161   : > { %v658_v3 = vadd.f32 %v657_v53, %v1654_v62  ;;  %v754_v55 = vadd.f32 %v753_v54, %v502_v52  ;;  %v659_v4 = vpop.f32.mrb[25].mxu0  ;;  %v755_v5 = vpop.f32.mrb[25].mxu1 }
 0x162   : > { %v660_v6 = vadd.f32 %v659_v4, %v1654_v62  ;;  %v756_v61 = vadd.f32 %v755_v5, %v502_v52 }
 0x163   : > { %800 = vst [vmem:[%s1663_s8 + $0xc0] sm:$0xff] %v658_v3  ;;  %832 = vst [vmem:[%s1663_s8 + $0x1c0] sm:$0xff] %v754_v55 }
 0x164   : > { %801 = vst [vmem:[%s1663_s8 + $0xc8] sm:$0xff] %v660_v6  ;;  %833 = vst [vmem:[%s1663_s8 + $0x1c8] sm:$0xff] %v756_v61  ;;  %v663_v8 = vpop.f32.mrb[26].mxu0  ;;  %v759_v9 = vpop.f32.mrb[26].mxu1 }
 0x165   : > { %v664_v10 = vadd.f32 %v663_v8, %v1656_v63  ;;  %v760_v11 = vadd.f32 %v759_v9, %v507_v7  ;;  %v665_v56 = vpop.f32.mrb[27].mxu0  ;;  %v761_v12 = vpop.f32.mrb[27].mxu1 }
 0x166   : > { %v666_v62 = vadd.f32 %v665_v56, %v1656_v63  ;;  %v762_v13 = vadd.f32 %v761_v12, %v507_v7 }
 0x167   : > { %802 = vst [vmem:[%s1663_s8 + $0xd0] sm:$0xff] %v664_v10  ;;  %834 = vst [vmem:[%s1663_s8 + $0x1d0] sm:$0xff] %v760_v11 }
 0x168   : > { %803 = vst [vmem:[%s1663_s8 + $0xd8] sm:$0xff] %v666_v62  ;;  %835 = vst [vmem:[%s1663_s8 + $0x1d8] sm:$0xff] %v762_v13  ;;  %v669_v15 = vpop.f32.mrb[28].mxu0  ;;  %v765_v16 = vpop.f32.mrb[28].mxu1 }
 0x169   : > { %v670_v17 = vadd.f32 %v669_v15, %v1658_v1  ;;  %v766_v18 = vadd.f32 %v765_v16, %v512_v14  ;;  %v671_v19 = vpop.f32.mrb[29].mxu0  ;;  %v767_v0 = vpop.f32.mrb[29].mxu1 }
 0x16a   : > { %v672_v63 = vadd.f32 %v671_v19, %v1658_v1  ;;  %v768_v20 = vadd.f32 %v767_v0, %v512_v14 }
 0x16b   : > { %804 = vst [vmem:[%s1663_s8 + $0xe0] sm:$0xff] %v670_v17  ;;  %836 = vst [vmem:[%s1663_s8 + $0x1e0] sm:$0xff] %v766_v18 }
 0x16c   : > { %805 = vst [vmem:[%s1663_s8 + $0xe8] sm:$0xff] %v672_v63  ;;  %837 = vst [vmem:[%s1663_s8 + $0x1e8] sm:$0xff] %v768_v20  ;;  %v675_v22 = vpop.f32.mrb[30].mxu0  ;;  %v771_v23 = vpop.f32.mrb[30].mxu1 }
 0x16d   : > { %v676_v24 = vadd.f32 %v675_v22, %v1660_v2  ;;  %v772_v25 = vadd.f32 %v771_v23, %v517_v21  ;;  %v677_v1 = vpop.f32.mrb[31].mxu0  ;;  %v773_v26 = vpop.f32.mrb[31].mxu1 }
 0x16e   : > { %v678_v27 = vadd.f32 %v677_v1, %v1660_v2  ;;  %v774_v57 = vadd.f32 %v773_v26, %v517_v21 }
 0x16f   : > { %806 = vst [vmem:[%s1663_s8 + $0xf0] sm:$0xff] %v676_v24  ;;  %838 = vst [vmem:[%s1663_s8 + $0x1f0] sm:$0xff] %v772_v25 }
 0x170   : > { %807 = vst [vmem:[%s1663_s8 + $0xf8] sm:$0xff] %v678_v27  ;;  %839 = vst [vmem:[%s1663_s8 + $0x1f8] sm:$0xff] %v774_v57 }
 0x171   : > { %1161 = shalt.err (!%p1158_p5)
}
 0x172   : > { %s1162_s5 = scalar_lea.hbm %s1753_s22, 8192  ;;  %s1166_s19 = scalar_lea.hbm %s1812_s3, 16384 }
 0x173   : > { %p1163_p4 = scmp.ne.s32.totalorder %s1753_s22, %s1162_s5  ;;  %p1167_p12 = scmp.lt.u32.totalorder %s1753_s22, %s1812_s3 }
 0x174   : > { %p1168_p1 = scmp.lt.u32.totalorder %s1166_s19, %s1162_s5  ;;  %p1170_p8 = scmp.lt.u32.totalorder %s1162_s5, %s1753_s22 }
 0x175   : > { %p1164_p7 = pnand %p1163_p4, %p1820_p9 }
 0x176   : > { %p1169_p3 = por %p1168_p1, %p1167_p12 }
 0x177   : > { %p1165_p10 = pneg %p1164_p7 }
 0x178   : > { %p1171_p11 = por %p1170_p8, %p1169_p3 }
 0x17a   : > { %p1172_p0 = pnand %p1171_p11, %p1165_p10 }
 0x17c   : > { %1175 = shalt.err (!%p1172_p0)
}
 0x17d   : > { %s1238_s8 = smov 256   ;;  %s1239_s21 = smov 16  }
 0x17e   : > { %1050 = dma.vmem_to_hbm [thread:$0]  (%p1820_p9), %s1755_s9, 8192, %s1753_s22, %s841_s23, %s1238_s8, %s1238_s8, %s1239_s21  }
 0x17f PF: > { %s874_s15 = sand.u32 1, %s1210_s12   ;;  %p1821_p6 = scmp.ne.s32.totalorder %s1817_s27, 0 }
 0x180   : > { %p1822_p13 = scmp.ge.s32.totalorder %s1230_s17, 2  ;;  %s875_s10 = scalar_lea.sflag [#allocation4], %s874_s15 }
 0x182   : > { %p1057_p2 = pnand %p1822_p13, %p1821_p6 }
 0x184   : > { %1205 = dma.done.wait (!%p1057_p2), %s875_s10, 8192  }
 0x185   : > { %1207 = vsyncadd (!%p1057_p2), %s875_s10, 4294959104  ;;  %s19_s17 = sadd.s32 1, %s1230_s17   ;;  %s1823_s12 = smov %s1214_s13 }
 0x186   : > { %p16_p5 = scmp.ge.s32.totalorder %s19_s17, 4   ;;  %s1824_s13 = smov %s1218_s14 }
 0x187   : > { %s1825_s14 = smov %s1316_s26  ;;  %s1826_s15 = smov %s1226_s16 }
 0x188   : > { %s1827_s16 = smov %s1829_s20  ;;  %18 = sbr.rel (!%p16_p5) target bundleno = 6 (0x6), region = 83 }
 0x18f   :  { %880 = vsyncpa [#allocation3], 1 }
 0x190   :  { %882 = vsyncpa [#allocation3 + $0x1], 1 }
 0x191   :  { %883 = vsyncpa [#allocation4], 1 }
 0x192   :  { %885 = vsyncpa [#allocation4 + $0x1], 1 }

</bundles_post_ra>
